<compile_context>
chip_gen: v6e
topology: v6e:2x2x1
jax: 0.10.0
libtpu: 0.0.40
codegen_flags: <defaults>
</compile_context>

<pallas_src>
import math
import functools

import jax
import jax.numpy as jnp
from jax import lax
from jax.experimental import pallas as pl
from jax.experimental.pallas import tpu as pltpu


def _mha_kernel(x_ref, wqkv_ref, bqkv_ref, wo_ref, bo_ref, out_ref, va_ref, *,
                n_batch, n_chunks, n_feature, seq_len, inv_scale):
    """Single-invocation kernel.

    x_ref:    (T, B*F)   time-major input with batch folded into lanes
    wqkv_ref: (F, 3F)    fused [Wq | Wk | Wv]
    bqkv_ref: (1, 3F)    fused [bq | bk | bv]
    wo_ref:   (F, F), bo_ref: (1, F)
    out_ref:  (T, B*F)
    va_ref:   (B*T, F)   VMEM scratch holding the concatenated head outputs
    """
    T, F, H = seq_len, n_feature, n_chunks
    C = F // H

    # Stack the B batch slabs (lanes b*F:(b+1)*F of the time-major input) into
    # one (B*T, F) matrix so the fused QKV projection is a single MXU matmul
    # with a lane-dense (3F = 144 > 128) output.
    x_all = jnp.concatenate(
        [x_ref[:, b * F:(b + 1) * F] for b in range(n_batch)], axis=0)   # (B*T, F)

    qkv = jnp.dot(x_all, wqkv_ref[...],
                  preferred_element_type=jnp.float32) + bqkv_ref[0]      # (B*T, 3F)

    q = qkv[:, :F] * inv_scale        # 1/scale hoisted out of the head loop
    k = qkv[:, F:2 * F]
    v = qkv[:, 2 * F:]

    # Static python loops over (batch, head): B*H = 6 tiny tiles.
    for b in range(n_batch):
        r0 = b * T
        for h in range(H):
            c0 = h * C
            qc = q[r0:r0 + T, c0:c0 + C]                                 # (T, C)
            kc = k[r0:r0 + T, c0:c0 + C]
            vc = v[r0:r0 + T, c0:c0 + C]

            # scores[i, j] = q_i . k_j  -- contract last dims, no explicit .T
            s = lax.dot_general(qc, kc, (((1,), (1,)), ((), ())),
                                preferred_element_type=jnp.float32)      # (T, T)
            s = s - jnp.max(s, axis=-1, keepdims=True)
            e = jnp.exp(s)
            p = e * pl.reciprocal(jnp.sum(e, axis=-1, keepdims=True))    # softmax

            # Write this head's output straight into its slice of the
            # concatenated buffer (avoids a lane-shuffle concat).
            va_ref[r0:r0 + T, c0:c0 + C] = jnp.dot(
                p, vc, preferred_element_type=jnp.float32)

    # Final output projection over the whole (B*T, F) slab.
    out_all = jnp.dot(va_ref[...], wo_ref[...],
                      preferred_element_type=jnp.float32) + bo_ref[0]    # (B*T, F)

    for b in range(n_batch):
        out_ref[:, b * F:(b + 1) * F] = (
            out_all[b * T:(b + 1) * T, :].astype(out_ref.dtype))


def multihead_attention(x_tbf, params, *, n_head, n_chunks=3):
    """x_tbf: (T, B, F) float32, matching the PyTorch forward() convention."""
    T, B, F = x_tbf.shape
    dk = F // n_head
    assert dk * n_head == F
    assert (F // n_chunks) * n_chunks == F
    inv_scale = 1.0 / math.sqrt(dk)

    wq, bq, wk, bk, wv, bv, wo, bo = params
    wqkv = jnp.concatenate([wq, wk, wv], axis=1)            # (F, 3F)
    bqkv = jnp.concatenate([bq, bk, bv]).reshape(1, 3 * F)  # (1, 3F)
    bo2 = bo.reshape(1, F)

    # Free, contiguous view: (T, B, F) -> (T, B*F). No HBM transpose.
    x2 = x_tbf.reshape(T, B * F)

    kernel = functools.partial(
        _mha_kernel, n_batch=B, n_chunks=n_chunks, n_feature=F,
        seq_len=T, inv_scale=inv_scale)

    out2 = pl.pallas_call(
        kernel,
        out_shape=jax.ShapeDtypeStruct((T, B * F), x_tbf.dtype),
        grid=(1,),
        in_specs=[
            pl.BlockSpec((T, B * F), lambda i: (0, 0)),     # x (lane-folded)
            pl.BlockSpec((F, 3 * F), lambda i: (0, 0)),     # fused Wqkv
            pl.BlockSpec((1, 3 * F), lambda i: (0, 0)),     # fused bqkv
            pl.BlockSpec((F, F), lambda i: (0, 0)),         # Wo
            pl.BlockSpec((1, F), lambda i: (0, 0)),         # bo
        ],
        out_specs=pl.BlockSpec((T, B * F), lambda i: (0, 0)),
        scratch_shapes=[pltpu.VMEM((B * T, F), jnp.float32)],
        compiler_params=pltpu.CompilerParams(
            dimension_semantics=("arbitrary",)),
    )(x2, wqkv, bqkv, wo, bo2)

    return out2.reshape(T, B, F)


def _init_linear(key, fan_in, fan_out):
    """PyTorch nn.Linear-style uniform init; weight stored as (in, out) so y = x @ W + b."""
    kw, kb = jax.random.split(key)
    bound = 1.0 / math.sqrt(fan_in)
    w = jax.random.uniform(kw, (fan_in, fan_out), jnp.float32, -bound, bound)
    b = jax.random.uniform(kb, (fan_out,), jnp.float32, -bound, bound)
    return w, b


def _reference(x, params, *, n_head, n_chunks=3):
    """Plain-JAX re-implementation of the PyTorch forward (for validation)."""
    T, B, F = x.shape
    scale = math.sqrt(F // n_head)
    wq, bq, wk, bk, wv, bv, wo, bo = params
    q = x @ wq + bq
    k = x @ wk + bk
    v = x @ wv + bv
    c = F // n_chunks
    outs = []
    for h in range(n_chunks):
        qc, kc, vc = (t[..., h * c:(h + 1) * c] for t in (q, k, v))
        s = jnp.einsum('tbc,sbc->bts', qc, kc) / scale
        a = jax.nn.softmax(s, axis=-1)
        outs.append(jnp.einsum('bts,sbc->tbc', a, vc))
    va = jnp.concatenate(outs, axis=-1)
    return va @ wo + bo


if __name__ == "__main__":
    T, B = 8, 2
    n_feature, n_head = 48, 4          # divisible by 3 (chunk) and by n_head

    key = jax.random.PRNGKey(0)
    kx, kq, kk, kv, ko = jax.random.split(key, 5)

    x = jax.random.normal(kx, (T, B, n_feature), jnp.float32)

    wq, bq = _init_linear(kq, n_feature, n_feature)
    wk, bk = _init_linear(kk, n_feature, n_feature)
    wv, bv = _init_linear(kv, n_feature, n_feature)
    wo, bo = _init_linear(ko, n_feature, n_feature)
    params = (wq, bq, wk, bk, wv, bv, wo, bo)

    out = multihead_attention(x, params, n_head=n_head)
    out = jax.block_until_ready(out)

    ref = _reference(x, params, n_head=n_head)
    assert out.shape == (T, B, n_feature)
    assert jnp.allclose(out, ref, atol=1e-4, rtol=1e-4), \
        float(jnp.max(jnp.abs(out - ref)))

    print("KERNEL_OK")
</pallas_src>

<mosaic_0001>
module attributes {stable_mosaic.version = 11 : i64} {
  func.func @_mha_kernel(%arg0: i32, %arg1: memref<8x96xf32, #tpu.memory_space<vmem>>, %arg2: memref<48x144xf32, #tpu.memory_space<vmem>>, %arg3: memref<1x144xf32, #tpu.memory_space<vmem>>, %arg4: memref<48x48xf32, #tpu.memory_space<vmem>>, %arg5: memref<1x48xf32, #tpu.memory_space<vmem>>, %arg6: memref<8x96xf32, #tpu.memory_space<vmem>>, %arg7: memref<16x48xf32, #tpu.memory_space<vmem>>) attributes {dimension_semantics = [#tpu.dimension_semantics<arbitrary>], iteration_bounds = array<i64: 1>, scalar_prefetch = 0 : i64, scratch_operands = 1 : i64, tpu.core_type = #tpu.core_type<tc>, window_params = [{pipeline_mode = #tpu.pipeline_mode<synchronous>, transform_indices = @transform_0, window_bounds = array<i64: 8, 96>}, {pipeline_mode = #tpu.pipeline_mode<synchronous>, transform_indices = @transform_1, window_bounds = array<i64: 48, 144>}, {pipeline_mode = #tpu.pipeline_mode<synchronous>, transform_indices = @transform_2, window_bounds = array<i64: 1, 144>}, {pipeline_mode = #tpu.pipeline_mode<synchronous>, transform_indices = @transform_3, window_bounds = array<i64: 48, 48>}, {pipeline_mode = #tpu.pipeline_mode<synchronous>, transform_indices = @transform_4, window_bounds = array<i64: 1, 48>}, {pipeline_mode = #tpu.pipeline_mode<synchronous>, transform_indices = @transform_5, window_bounds = array<i64: 8, 96>}]} {
    %c0 = arith.constant 0 : index
    %c0_0 = arith.constant 0 : index
    %0 = vector.load %arg1[%c0, %c0_0] : memref<8x96xf32, #tpu.memory_space<vmem>>, vector<8x48xf32>
    %c0_1 = arith.constant 0 : index
    %c48 = arith.constant 48 : index
    %1 = vector.load %arg1[%c0_1, %c48] : memref<8x96xf32, #tpu.memory_space<vmem>>, vector<8x48xf32>
    %2 = tpu.concatenate %0, %1 in 0 : vector<8x48xf32>, vector<8x48xf32> -> vector<16x48xf32>
    %c0_2 = arith.constant 0 : index
    %c0_3 = arith.constant 0 : index
    %3 = vector.load %arg2[%c0_2, %c0_3] : memref<48x144xf32, #tpu.memory_space<vmem>>, vector<48x144xf32>
    %cst = arith.constant dense<0.000000e+00> : vector<16x144xf32>
    %4 = tpu.matmul %2, %3, %cst {dimension_numbers = #tpu.dot_dimension_numbers<[1], [0], [0], [1], [0, 0, 1, 1], [], []>} : vector<16x48xf32>, vector<48x144xf32>, vector<16x144xf32> -> vector<16x144xf32>
    %c0_4 = arith.constant 0 : index
    %c0_5 = arith.constant 0 : index
    %5 = vector.load %arg3[%c0_4, %c0_5] : memref<1x144xf32, #tpu.memory_space<vmem>>, vector<1x144xf32>
    %6 = vector.shape_cast %5 : vector<1x144xf32> to vector<144xf32>
    %7 = vector.shape_cast %6 : vector<144xf32> to vector<1x144xf32>
    %8 = vector.broadcast %7 : vector<1x144xf32> to vector<16x144xf32>
    %9 = arith.addf %4, %8 : vector<16x144xf32>
    %10 = vector.extract_strided_slice %9 {offsets = [0, 0], sizes = [16, 48], strides = [1, 1]} : vector<16x144xf32> to vector<16x48xf32>
    %cst_6 = arith.constant 0.288675129 : f32
    %11 = vector.broadcast %cst_6 : f32 to vector<16x48xf32>
    %12 = arith.mulf %10, %11 : vector<16x48xf32>
    %13 = vector.extract_strided_slice %9 {offsets = [0, 48], sizes = [16, 48], strides = [1, 1]} : vector<16x144xf32> to vector<16x48xf32>
    %14 = vector.extract_strided_slice %9 {offsets = [0, 96], sizes = [16, 48], strides = [1, 1]} : vector<16x144xf32> to vector<16x48xf32>
    %15 = vector.extract_strided_slice %12 {offsets = [0, 0], sizes = [8, 16], strides = [1, 1]} : vector<16x48xf32> to vector<8x16xf32>
    %16 = vector.extract_strided_slice %13 {offsets = [0, 0], sizes = [8, 16], strides = [1, 1]} : vector<16x48xf32> to vector<8x16xf32>
    %17 = vector.extract_strided_slice %14 {offsets = [0, 0], sizes = [8, 16], strides = [1, 1]} : vector<16x48xf32> to vector<8x16xf32>
    %cst_7 = arith.constant dense<0.000000e+00> : vector<8x8xf32>
    %18 = tpu.matmul %15, %16, %cst_7 {dimension_numbers = #tpu.dot_dimension_numbers<[1], [1], [0], [0], [0, 0, 1, 0], [], []>} : vector<8x16xf32>, vector<8x16xf32>, vector<8x8xf32> -> vector<8x8xf32>
    %cst_8 = arith.constant dense<0xFF800000> : vector<8xf32>
    %19 = vector.multi_reduction <maximumf>, %18, %cst_8 [1] : vector<8x8xf32> to vector<8xf32>
    %20 = vector.shape_cast %19 : vector<8xf32> to vector<8x1xf32>
    %21 = vector.broadcast %20 : vector<8x1xf32> to vector<8x8xf32>
    %22 = arith.subf %18, %21 : vector<8x8xf32>
    %23 = math.exp %22 : vector<8x8xf32>
    %cst_9 = arith.constant dense<0.000000e+00> : vector<8xf32>
    %24 = vector.multi_reduction <add>, %23, %cst_9 [1] : vector<8x8xf32> to vector<8xf32>
    %25 = vector.shape_cast %24 : vector<8xf32> to vector<8x1xf32>
    %26 = tpu.reciprocal %25 : vector<8x1xf32> -> vector<8x1xf32>
    %27 = vector.broadcast %26 : vector<8x1xf32> to vector<8x8xf32>
    %28 = arith.mulf %23, %27 : vector<8x8xf32>
    %cst_10 = arith.constant dense<0.000000e+00> : vector<8x16xf32>
    %29 = tpu.matmul %28, %17, %cst_10 {dimension_numbers = #tpu.dot_dimension_numbers<[1], [0], [0], [1], [0, 0, 1, 1], [], []>} : vector<8x8xf32>, vector<8x16xf32>, vector<8x16xf32> -> vector<8x16xf32>
    %c0_11 = arith.constant 0 : index
    %c0_12 = arith.constant 0 : index
    %30 = vector.load %arg7[%c0_11, %c0_12] : memref<16x48xf32, #tpu.memory_space<vmem>>, vector<8x16xf32>
    tpu.vector_store %arg7[%c0_11, %c0_12], %29 {strides = array<i32>} : memref<16x48xf32, #tpu.memory_space<vmem>>, vector<8x16xf32>,
    %31 = vector.extract_strided_slice %12 {offsets = [0, 16], sizes = [8, 16], strides = [1, 1]} : vector<16x48xf32> to vector<8x16xf32>
    %32 = vector.extract_strided_slice %13 {offsets = [0, 16], sizes = [8, 16], strides = [1, 1]} : vector<16x48xf32> to vector<8x16xf32>
    %33 = vector.extract_strided_slice %14 {offsets = [0, 16], sizes = [8, 16], strides = [1, 1]} : vector<16x48xf32> to vector<8x16xf32>
    %cst_13 = arith.constant dense<0.000000e+00> : vector<8x8xf32>
    %34 = tpu.matmul %31, %32, %cst_13 {dimension_numbers = #tpu.dot_dimension_numbers<[1], [1], [0], [0], [0, 0, 1, 0], [], []>} : vector<8x16xf32>, vector<8x16xf32>, vector<8x8xf32> -> vector<8x8xf32>
    %cst_14 = arith.constant dense<0xFF800000> : vector<8xf32>
    %35 = vector.multi_reduction <maximumf>, %34, %cst_14 [1] : vector<8x8xf32> to vector<8xf32>
    %36 = vector.shape_cast %35 : vector<8xf32> to vector<8x1xf32>
    %37 = vector.broadcast %36 : vector<8x1xf32> to vector<8x8xf32>
    %38 = arith.subf %34, %37 : vector<8x8xf32>
    %39 = math.exp %38 : vector<8x8xf32>
    %cst_15 = arith.constant dense<0.000000e+00> : vector<8xf32>
    %40 = vector.multi_reduction <add>, %39, %cst_15 [1] : vector<8x8xf32> to vector<8xf32>
    %41 = vector.shape_cast %40 : vector<8xf32> to vector<8x1xf32>
    %42 = tpu.reciprocal %41 : vector<8x1xf32> -> vector<8x1xf32>
    %43 = vector.broadcast %42 : vector<8x1xf32> to vector<8x8xf32>
    %44 = arith.mulf %39, %43 : vector<8x8xf32>
    %cst_16 = arith.constant dense<0.000000e+00> : vector<8x16xf32>
    %45 = tpu.matmul %44, %33, %cst_16 {dimension_numbers = #tpu.dot_dimension_numbers<[1], [0], [0], [1], [0, 0, 1, 1], [], []>} : vector<8x8xf32>, vector<8x16xf32>, vector<8x16xf32> -> vector<8x16xf32>
    %c0_17 = arith.constant 0 : index
    %c16 = arith.constant 16 : index
    %46 = vector.load %arg7[%c0_17, %c16] : memref<16x48xf32, #tpu.memory_space<vmem>>, vector<8x16xf32>
    tpu.vector_store %arg7[%c0_17, %c16], %45 {strides = array<i32>} : memref<16x48xf32, #tpu.memory_space<vmem>>, vector<8x16xf32>,
    %47 = vector.extract_strided_slice %12 {offsets = [0, 32], sizes = [8, 16], strides = [1, 1]} : vector<16x48xf32> to vector<8x16xf32>
    %48 = vector.extract_strided_slice %13 {offsets = [0, 32], sizes = [8, 16], strides = [1, 1]} : vector<16x48xf32> to vector<8x16xf32>
    %49 = vector.extract_strided_slice %14 {offsets = [0, 32], sizes = [8, 16], strides = [1, 1]} : vector<16x48xf32> to vector<8x16xf32>
    %cst_18 = arith.constant dense<0.000000e+00> : vector<8x8xf32>
    %50 = tpu.matmul %47, %48, %cst_18 {dimension_numbers = #tpu.dot_dimension_numbers<[1], [1], [0], [0], [0, 0, 1, 0], [], []>} : vector<8x16xf32>, vector<8x16xf32>, vector<8x8xf32> -> vector<8x8xf32>
    %cst_19 = arith.constant dense<0xFF800000> : vector<8xf32>
    %51 = vector.multi_reduction <maximumf>, %50, %cst_19 [1] : vector<8x8xf32> to vector<8xf32>
    %52 = vector.shape_cast %51 : vector<8xf32> to vector<8x1xf32>
    %53 = vector.broadcast %52 : vector<8x1xf32> to vector<8x8xf32>
    %54 = arith.subf %50, %53 : vector<8x8xf32>
    %55 = math.exp %54 : vector<8x8xf32>
    %cst_20 = arith.constant dense<0.000000e+00> : vector<8xf32>
    %56 = vector.multi_reduction <add>, %55, %cst_20 [1] : vector<8x8xf32> to vector<8xf32>
    %57 = vector.shape_cast %56 : vector<8xf32> to vector<8x1xf32>
    %58 = tpu.reciprocal %57 : vector<8x1xf32> -> vector<8x1xf32>
    %59 = vector.broadcast %58 : vector<8x1xf32> to vector<8x8xf32>
    %60 = arith.mulf %55, %59 : vector<8x8xf32>
    %cst_21 = arith.constant dense<0.000000e+00> : vector<8x16xf32>
    %61 = tpu.matmul %60, %49, %cst_21 {dimension_numbers = #tpu.dot_dimension_numbers<[1], [0], [0], [1], [0, 0, 1, 1], [], []>} : vector<8x8xf32>, vector<8x16xf32>, vector<8x16xf32> -> vector<8x16xf32>
    %c0_22 = arith.constant 0 : index
    %c32 = arith.constant 32 : index
    %62 = vector.load %arg7[%c0_22, %c32] : memref<16x48xf32, #tpu.memory_space<vmem>>, vector<8x16xf32>
    tpu.vector_store %arg7[%c0_22, %c32], %61 {strides = array<i32>} : memref<16x48xf32, #tpu.memory_space<vmem>>, vector<8x16xf32>,
    %63 = vector.extract_strided_slice %12 {offsets = [8, 0], sizes = [8, 16], strides = [1, 1]} : vector<16x48xf32> to vector<8x16xf32>
    %64 = vector.extract_strided_slice %13 {offsets = [8, 0], sizes = [8, 16], strides = [1, 1]} : vector<16x48xf32> to vector<8x16xf32>
    %65 = vector.extract_strided_slice %14 {offsets = [8, 0], sizes = [8, 16], strides = [1, 1]} : vector<16x48xf32> to vector<8x16xf32>
    %cst_23 = arith.constant dense<0.000000e+00> : vector<8x8xf32>
    %66 = tpu.matmul %63, %64, %cst_23 {dimension_numbers = #tpu.dot_dimension_numbers<[1], [1], [0], [0], [0, 0, 1, 0], [], []>} : vector<8x16xf32>, vector<8x16xf32>, vector<8x8xf32> -> vector<8x8xf32>
    %cst_24 = arith.constant dense<0xFF800000> : vector<8xf32>
    %67 = vector.multi_reduction <maximumf>, %66, %cst_24 [1] : vector<8x8xf32> to vector<8xf32>
    %68 = vector.shape_cast %67 : vector<8xf32> to vector<8x1xf32>
    %69 = vector.broadcast %68 : vector<8x1xf32> to vector<8x8xf32>
    %70 = arith.subf %66, %69 : vector<8x8xf32>
    %71 = math.exp %70 : vector<8x8xf32>
    %cst_25 = arith.constant dense<0.000000e+00> : vector<8xf32>
    %72 = vector.multi_reduction <add>, %71, %cst_25 [1] : vector<8x8xf32> to vector<8xf32>
    %73 = vector.shape_cast %72 : vector<8xf32> to vector<8x1xf32>
    %74 = tpu.reciprocal %73 : vector<8x1xf32> -> vector<8x1xf32>
    %75 = vector.broadcast %74 : vector<8x1xf32> to vector<8x8xf32>
    %76 = arith.mulf %71, %75 : vector<8x8xf32>
    %cst_26 = arith.constant dense<0.000000e+00> : vector<8x16xf32>
    %77 = tpu.matmul %76, %65, %cst_26 {dimension_numbers = #tpu.dot_dimension_numbers<[1], [0], [0], [1], [0, 0, 1, 1], [], []>} : vector<8x8xf32>, vector<8x16xf32>, vector<8x16xf32> -> vector<8x16xf32>
    %c8 = arith.constant 8 : index
    %c0_27 = arith.constant 0 : index
    %78 = vector.load %arg7[%c8, %c0_27] : memref<16x48xf32, #tpu.memory_space<vmem>>, vector<8x16xf32>
    tpu.vector_store %arg7[%c8, %c0_27], %77 {strides = array<i32>} : memref<16x48xf32, #tpu.memory_space<vmem>>, vector<8x16xf32>,
    %79 = vector.extract_strided_slice %12 {offsets = [8, 16], sizes = [8, 16], strides = [1, 1]} : vector<16x48xf32> to vector<8x16xf32>
    %80 = vector.extract_strided_slice %13 {offsets = [8, 16], sizes = [8, 16], strides = [1, 1]} : vector<16x48xf32> to vector<8x16xf32>
    %81 = vector.extract_strided_slice %14 {offsets = [8, 16], sizes = [8, 16], strides = [1, 1]} : vector<16x48xf32> to vector<8x16xf32>
    %cst_28 = arith.constant dense<0.000000e+00> : vector<8x8xf32>
    %82 = tpu.matmul %79, %80, %cst_28 {dimension_numbers = #tpu.dot_dimension_numbers<[1], [1], [0], [0], [0, 0, 1, 0], [], []>} : vector<8x16xf32>, vector<8x16xf32>, vector<8x8xf32> -> vector<8x8xf32>
    %cst_29 = arith.constant dense<0xFF800000> : vector<8xf32>
    %83 = vector.multi_reduction <maximumf>, %82, %cst_29 [1] : vector<8x8xf32> to vector<8xf32>
    %84 = vector.shape_cast %83 : vector<8xf32> to vector<8x1xf32>
    %85 = vector.broadcast %84 : vector<8x1xf32> to vector<8x8xf32>
    %86 = arith.subf %82, %85 : vector<8x8xf32>
    %87 = math.exp %86 : vector<8x8xf32>
    %cst_30 = arith.constant dense<0.000000e+00> : vector<8xf32>
    %88 = vector.multi_reduction <add>, %87, %cst_30 [1] : vector<8x8xf32> to vector<8xf32>
    %89 = vector.shape_cast %88 : vector<8xf32> to vector<8x1xf32>
    %90 = tpu.reciprocal %89 : vector<8x1xf32> -> vector<8x1xf32>
    %91 = vector.broadcast %90 : vector<8x1xf32> to vector<8x8xf32>
    %92 = arith.mulf %87, %91 : vector<8x8xf32>
    %cst_31 = arith.constant dense<0.000000e+00> : vector<8x16xf32>
    %93 = tpu.matmul %92, %81, %cst_31 {dimension_numbers = #tpu.dot_dimension_numbers<[1], [0], [0], [1], [0, 0, 1, 1], [], []>} : vector<8x8xf32>, vector<8x16xf32>, vector<8x16xf32> -> vector<8x16xf32>
    %c8_32 = arith.constant 8 : index
    %c16_33 = arith.constant 16 : index
    %94 = vector.load %arg7[%c8_32, %c16_33] : memref<16x48xf32, #tpu.memory_space<vmem>>, vector<8x16xf32>
    tpu.vector_store %arg7[%c8_32, %c16_33], %93 {strides = array<i32>} : memref<16x48xf32, #tpu.memory_space<vmem>>, vector<8x16xf32>,
    %95 = vector.extract_strided_slice %12 {offsets = [8, 32], sizes = [8, 16], strides = [1, 1]} : vector<16x48xf32> to vector<8x16xf32>
    %96 = vector.extract_strided_slice %13 {offsets = [8, 32], sizes = [8, 16], strides = [1, 1]} : vector<16x48xf32> to vector<8x16xf32>
    %97 = vector.extract_strided_slice %14 {offsets = [8, 32], sizes = [8, 16], strides = [1, 1]} : vector<16x48xf32> to vector<8x16xf32>
    %cst_34 = arith.constant dense<0.000000e+00> : vector<8x8xf32>
    %98 = tpu.matmul %95, %96, %cst_34 {dimension_numbers = #tpu.dot_dimension_numbers<[1], [1], [0], [0], [0, 0, 1, 0], [], []>} : vector<8x16xf32>, vector<8x16xf32>, vector<8x8xf32> -> vector<8x8xf32>
    %cst_35 = arith.constant dense<0xFF800000> : vector<8xf32>
    %99 = vector.multi_reduction <maximumf>, %98, %cst_35 [1] : vector<8x8xf32> to vector<8xf32>
    %100 = vector.shape_cast %99 : vector<8xf32> to vector<8x1xf32>
    %101 = vector.broadcast %100 : vector<8x1xf32> to vector<8x8xf32>
    %102 = arith.subf %98, %101 : vector<8x8xf32>
    %103 = math.exp %102 : vector<8x8xf32>
    %cst_36 = arith.constant dense<0.000000e+00> : vector<8xf32>
    %104 = vector.multi_reduction <add>, %103, %cst_36 [1] : vector<8x8xf32> to vector<8xf32>
    %105 = vector.shape_cast %104 : vector<8xf32> to vector<8x1xf32>
    %106 = tpu.reciprocal %105 : vector<8x1xf32> -> vector<8x1xf32>
    %107 = vector.broadcast %106 : vector<8x1xf32> to vector<8x8xf32>
    %108 = arith.mulf %103, %107 : vector<8x8xf32>
    %cst_37 = arith.constant dense<0.000000e+00> : vector<8x16xf32>
    %109 = tpu.matmul %108, %97, %cst_37 {dimension_numbers = #tpu.dot_dimension_numbers<[1], [0], [0], [1], [0, 0, 1, 1], [], []>} : vector<8x8xf32>, vector<8x16xf32>, vector<8x16xf32> -> vector<8x16xf32>
    %c8_38 = arith.constant 8 : index
    %c32_39 = arith.constant 32 : index
    %110 = vector.load %arg7[%c8_38, %c32_39] : memref<16x48xf32, #tpu.memory_space<vmem>>, vector<8x16xf32>
    tpu.vector_store %arg7[%c8_38, %c32_39], %109 {strides = array<i32>} : memref<16x48xf32, #tpu.memory_space<vmem>>, vector<8x16xf32>,
    %c0_40 = arith.constant 0 : index
    %c0_41 = arith.constant 0 : index
    %111 = vector.load %arg7[%c0_40, %c0_41] : memref<16x48xf32, #tpu.memory_space<vmem>>, vector<16x48xf32>
    %c0_42 = arith.constant 0 : index
    %c0_43 = arith.constant 0 : index
    %112 = vector.load %arg4[%c0_42, %c0_43] : memref<48x48xf32, #tpu.memory_space<vmem>>, vector<48x48xf32>
    %cst_44 = arith.constant dense<0.000000e+00> : vector<16x48xf32>
    %113 = tpu.matmul %111, %112, %cst_44 {dimension_numbers = #tpu.dot_dimension_numbers<[1], [0], [0], [1], [0, 0, 1, 1], [], []>} : vector<16x48xf32>, vector<48x48xf32>, vector<16x48xf32> -> vector<16x48xf32>
    %c0_45 = arith.constant 0 : index
    %c0_46 = arith.constant 0 : index
    %114 = vector.load %arg5[%c0_45, %c0_46] : memref<1x48xf32, #tpu.memory_space<vmem>>, vector<1x48xf32>
    %115 = vector.shape_cast %114 : vector<1x48xf32> to vector<48xf32>
    %116 = vector.shape_cast %115 : vector<48xf32> to vector<1x48xf32>
    %117 = vector.broadcast %116 : vector<1x48xf32> to vector<16x48xf32>
    %118 = arith.addf %113, %117 : vector<16x48xf32>
    %119 = vector.extract_strided_slice %118 {offsets = [0, 0], sizes = [8, 48], strides = [1, 1]} : vector<16x48xf32> to vector<8x48xf32>
    %c0_47 = arith.constant 0 : index
    %c0_48 = arith.constant 0 : index
    %120 = vector.load %arg6[%c0_47, %c0_48] : memref<8x96xf32, #tpu.memory_space<vmem>>, vector<8x48xf32>
    tpu.vector_store %arg6[%c0_47, %c0_48], %119 {strides = array<i32>} : memref<8x96xf32, #tpu.memory_space<vmem>>, vector<8x48xf32>,
    %121 = vector.extract_strided_slice %118 {offsets = [8, 0], sizes = [8, 48], strides = [1, 1]} : vector<16x48xf32> to vector<8x48xf32>
    %c0_49 = arith.constant 0 : index
    %c48_50 = arith.constant 48 : index
    %122 = vector.load %arg6[%c0_49, %c48_50] : memref<8x96xf32, #tpu.memory_space<vmem>>, vector<8x48xf32>
    tpu.vector_store %arg6[%c0_49, %c48_50], %121 {strides = array<i32>} : memref<8x96xf32, #tpu.memory_space<vmem>>, vector<8x48xf32>,
    return
  }
  func.func @transform_0(%arg0: i32) -> (i32, i32) {
    %c0_i32 = arith.constant 0 : i32
    %c0_i32_0 = arith.constant 0 : i32
    %c0_i32_1 = arith.constant 0 : i32
    return %c0_i32, %c0_i32_0 : i32, i32
  }
  func.func @transform_1(%arg0: i32) -> (i32, i32) {
    %c0_i32 = arith.constant 0 : i32
    %c0_i32_0 = arith.constant 0 : i32
    %c0_i32_1 = arith.constant 0 : i32
    return %c0_i32, %c0_i32_0 : i32, i32
  }
  func.func @transform_2(%arg0: i32) -> (i32, i32) {
    %c0_i32 = arith.constant 0 : i32
    %c0_i32_0 = arith.constant 0 : i32
    %c0_i32_1 = arith.constant 0 : i32
    return %c0_i32, %c0_i32_0 : i32, i32
  }
  func.func @transform_3(%arg0: i32) -> (i32, i32) {
    %c0_i32 = arith.constant 0 : i32
    %c0_i32_0 = arith.constant 0 : i32
    %c0_i32_1 = arith.constant 0 : i32
    return %c0_i32, %c0_i32_0 : i32, i32
  }
  func.func @transform_4(%arg0: i32) -> (i32, i32) {
    %c0_i32 = arith.constant 0 : i32
    %c0_i32_0 = arith.constant 0 : i32
    %c0_i32_1 = arith.constant 0 : i32
    return %c0_i32, %c0_i32_0 : i32, i32
  }
  func.func @transform_5(%arg0: i32) -> (i32, i32) {
    %c0_i32 = arith.constant 0 : i32
    %c0_i32_0 = arith.constant 0 : i32
    %c0_i32_1 = arith.constant 0 : i32
    return %c0_i32, %c0_i32_0 : i32, i32
  }
}

</mosaic_0001>

<bundles_post_ra>
// kernel: tpu_custom_call.1
= control target key start
LH: loop header
LB: loop body
LE: loop exit
PB: predicated region body
PF: predicated region fallthrough
CT: control target
= control target key end

     0   :  { %10 = vsyncpa [#allocation4], 0  ;;  %s1744_s0 = inlined_call_operand.hbm [shape: f32[8,96], index: 0, kind: input, shape index: {}]   ;;  %s1745_s1 = inlined_call_operand.hbm [shape: f32[48,144], index: 1, kind: input, shape index: {}]   ;;  %s1746_s2 = inlined_call_operand.vmem [shape: f32[1,144], index: 2, kind: input, shape index: {}]   ;;  %s1747_s3 = inlined_call_operand.hbm [shape: f32[48,48], index: 3, kind: input, shape index: {}]   ;;  %s1748_s4 = inlined_call_operand.vmem [shape: f32[1,48], index: 4, kind: input, shape index: {}]   ;;  %s1749_s5 = inlined_call_operand.hbm [shape: f32[8,96], index: 5, kind: output, shape index: {}]  }
   0x1   :  { %11 = vsyncpa [#allocation7], 0 }
   0x2   :  { %12 = vsyncpa [#allocation5], 0  ;;  %s1557_s18 = smov [#allocation6]  }
   0x3   :  { %s28_s19 = sshll.u32 %s1557_s18, 4  ;;  %s29_s19 = int_to_ptr.vmem [resolvable:$true] %s28_s19 }
   0x4   :  { %s1479_s20 = scalar_lea.vmem %s29_s19, 1536  ;;  %p1484_p1 = scmp.lt.s32.totalorder %s29_s19, %s29_s19 }
   0x5   :  { %p1480_p0 = scmp.ne.s32.totalorder %s29_s19, %s1479_s20  ;;  %p1485_p2 = scmp.lt.s32.totalorder %s1479_s20, %s1479_s20 }
   0x7   :  { %p1486_p3 = por %p1485_p2, %p1484_p1 }
   0x9   :  { %p1487_p4 = pnand %p1486_p3, %p1480_p0 }
   0xb   :  { %1490 = shalt.err (!%p1487_p4)
}
   0xc   :  { %s1558_s21 = smov 256   ;;  %s1559_s22 = smov 16  }
   0xd   :  { %34 = dma.hbm_to_vmem [thread:$0]  %s1745_s1, 1536, %s29_s19, [#allocation7], %s1558_s21, %s1558_s21, %s1559_s22  }
   0xe   :  { %s1560_s25 = smov [#allocation3]   ;;  %s1561_s27 = smov [#allocation8]  }
   0xf   :  { %s19_s26 = sshll.u32 %s1560_s25, 4  ;;  %s42_s28 = sshll.u32 %s1561_s27, 4  ;;  %s20_s26 = int_to_ptr.vmem [resolvable:$true] %s19_s26  ;;  %s43_s28 = int_to_ptr.vmem [resolvable:$true] %s42_s28 }
  0x10   :  { %s1499_s29 = scalar_lea.vmem %s20_s26, 128  ;;  %p1504_p6 = scmp.lt.s32.totalorder %s20_s26, %s20_s26 }
  0x11   :  { %p1500_p5 = scmp.ne.s32.totalorder %s20_s26, %s1499_s29  ;;  %p1505_p7 = scmp.lt.s32.totalorder %s1499_s29, %s1499_s29 }
  0x13   :  { %p1506_p8 = por %p1505_p7, %p1504_p6 }
  0x15   :  { %p1507_p9 = pnand %p1506_p8, %p1500_p5 }
  0x17   :  { %1510 = shalt.err (!%p1507_p9)
}
  0x18   :  { %22 = dma.hbm_to_vmem [thread:$0]  %s1744_s0, 128, %s20_s26, [#allocation4]  }
  0x19   :  { %s1519_s7 = scalar_lea.vmem %s43_s28, 768  ;;  %p1524_p11 = scmp.lt.s32.totalorder %s43_s28, %s43_s28 }
  0x1a   :  { %p1520_p10 = scmp.ne.s32.totalorder %s43_s28, %s1519_s7  ;;  %p1525_p12 = scmp.lt.s32.totalorder %s1519_s7, %s1519_s7 }
  0x1c   :  { %p1526_p13 = por %p1525_p12, %p1524_p11 }
  0x1e   :  { %p1527_p0 = pnand %p1526_p13, %p1520_p10 }
  0x20   :  { %1530 = shalt.err (!%p1527_p0)
}
  0x21   :  { %s1562_s1 = smov 128   ;;  %s1563_s8 = smov 8  }
  0x22   :  { %48 = dma.hbm_to_vmem [thread:$0]  %s1747_s3, 768, %s43_s28, [#allocation7], %s1562_s1, %s1562_s1, %s1563_s8  }
  0x23   :  { %1551 = dma.done.wait [#allocation4], 128  }
  0x24   :  { %1552 = vsyncadd [#allocation4], 4294967168 }
  0x25   :  { %1553 = dma.done.wait [#allocation7], 2304  }
  0x26   :  { %1554 = vsyncadd [#allocation7], 4294964992  ;;  %v1564_v0 = vmov 0.0   ;;  %v75_v1 = vld [vmem:[#allocation6 + $0x58] sm:$0xff]  ;;  %v74_v2 = vld [vmem:[#allocation6 + $0x50] sm:$0xff]  ;;  %vm88_vm0 = vcmask 392192   ;;  %v78_v14 = vlaneseq }
  0x27   :  { %157 = vmatprep.mubr.f32.mxu0 %v1564_v0  ;;  %1356 = vmatprep.subr.mxu1 %v1564_v0  ;;  %v73_v3 = vld [vmem:[#allocation6 + $0x48] sm:$0xff]  ;;  %v72_v4 = vld [vmem:[#allocation6 + $0x40] sm:$0xff]  ;;  %v71_v5 = vld [vmem:[#allocation6 + $0x38] sm:$0xff]  ;;  %vm1565_vm1 = vmmov 0   ;;  %s1566_s11 = smov 32   ;;  %s1567_s12 = smov 80  }
  0x28   :  { %113 = vmatprep.subr.mxu0 %v75_v1  ;;  %v70_v6 = vld [vmem:[#allocation6 + $0x30] sm:$0xff]  ;;  %v69_v7 = vld [vmem:[#allocation6 + $0x28] sm:$0xff]  ;;  %v68_v8 = vld [vmem:[#allocation6 + $0x20] sm:$0xff]  ;;  %v1618_v15 = vshrl.u32 %v78_v14, 7  ;;  %1358 = vmatprep.mubr.msk.f32.mxu1 %vm1565_vm1, %v1564_v0  ;;  %s1568_s13 = smov 64   ;;  %vm175_vm2 = vcmask 130048  }
  0x29   :  { %114 = vmatpush1.msra.mxu0 %v74_v2  ;;  %v67_v9 = vld [vmem:[#allocation6 + $0x18] sm:$0xff]  ;;  %v66_v10 = vld [vmem:[#allocation6 + $0x10] sm:$0xff]  ;;  %v65_v11 = vld [vmem:[#allocation6 + $0x8] sm:$0xff]  ;;  %vm251_vm3 = vcmask 64512   ;;  %s1570_s14 = smov 112   ;;  %s1571_s15 = smov 96  }
  0x2a   :  { %115 = vmatprep.subr.mxu0 %v73_v3  ;;  %v64_v12 = vld [vmem:[#allocation6] sm:$0xff]  ;;  %v60_v13 = vld [vmem:[#allocation3] sm:$0xff]  ;;  %v80_v16 = vsub.s32 0, %v1618_v15  ;;  %v1626_v17 = vld [vmem:[%s1746_s2] sm:$0x3]  ;;  %s1569_s2 = smov 48  }
  0x2b   :  { %116 = vmatpush1.msra.mxu0 %v72_v4  ;;  %v84_v58 = vsub.s32 1, %v1618_v15  ;;  %vm509_vm4 = vcmask 261248   ;;  %vm677_vm5 = vcmask 392448   ;;  %s1572_s18 = smov [#allocation9]   ;;  %vm1283_vm6 = vcmask 785792  }
  0x2c   :  { %117 = vmatprep.subr.mxu0 %v71_v5  ;;  %v1629_v18 = vrot.slane %v1626_v17, %v80_v16  ;;  %s1291_s19 = sshll.u32 %s1572_s18, 4  ;;  %s1292_s19 = int_to_ptr.vmem [resolvable:$true] %s1291_s19 }
  0x2d   :  { %118 = vmatpush1.msra.mxu0 %v70_v6  ;;  %v1682_v62 = vrot.slane %v1626_v17, %v84_v58  ;;  %v1186_v58 = vld [vmem:[#allocation8 + $0x10] sm:$0xff]  ;;  %s1531_s20 = scalar_lea.vmem %s1292_s19, 128  ;;  %p1536_p2 = scmp.lt.s32.totalorder %s1292_s19, %s1292_s19 }
  0x2e   :  { %119 = vmatprep.subr.mxu0 %v69_v7  ;;  %p1532_p1 = scmp.ne.s32.totalorder %s1292_s19, %s1531_s20  ;;  %p1537_p3 = scmp.lt.s32.totalorder %s1531_s20, %s1531_s20 }
  0x2f   :  { %120 = vmatpush1.msra.mxu0 %v68_v8 }
  0x30   :  { %121 = vmatprep.subr.mxu0 %v67_v9  ;;  %p1538_p4 = por %p1537_p3, %p1536_p2 }
  0x31   :  { %122 = vmatpush1.msra.mxu0 %v66_v10 }
  0x32   :  { %123 = vmatprep.subr.mxu0 %v65_v11  ;;  %p1539_p5 = pnand %p1538_p4, %p1532_p1 }
  0x33   :  { %124 = vmatpush1.msra.mxu0 %v64_v12 }
  0x34   :  { %1301 = vmatmul.mubr.msk.f32.vlgmr.msra.gmra.mxu0 %vm88_vm0, %v60_v13  ;;  %1386 = vmatprep.subr.mxu0 %v1564_v0 }
  0x35   :  { %163 = vmatprep.mubr.f32.mxu0 %v1564_v0 }
  0xf4   :  { %v159_v19 = vpop.f32.mrf.mxu0 }
  0xf5   :  { %v160_v20 = vadd.f32 %v159_v19, %v1629_v18 }
  0xf6   :  { %v161_v44 = vpop.f32.mrf.mxu0 }
  0xf7   :  { %263 = vrot.lane.b32.xlu1 %v160_v20, %s1566_s11  ;;  %173 = vrot.lane.b32.xlu0 %v160_v20, %s1567_s12  ;;  %v170_v22 = vmul.f32 0.28867513, %v160_v20  ;;  %v162_v1 = vadd.f32 %v161_v44, %v1682_v62 }
  0xfb   :  { %342 = vrot.lane.b32.xlu1 %v160_v20, %s1568_s13 }
 0x169   :  { %v174_v21 = vpop.permute.xlu0 %173  ;;  %v264_v23 = vpop.permute.xlu1 %263 }
 0x16a   :  { %1357 = vmatpush3.xpose.msk.msra.mxu1 %vm175_vm2, %v174_v21 }
 0x16b   :  { %1361 = vmatprep.subr.mxu1 %v1564_v0 }
 0x16d   :  { %1359 = vmatmul.mubr.msk.f32.vlgmr.msra.gmra.mxu1 %vm175_vm2, %v170_v22  ;;  %v343_v32 = vpop.permute.xlu1 %342 }
 0x16e   :  { %1362 = vmatpush3.msra.mxu1 %v264_v23  ;;  %1363 = vmatprep.mubr.msk.f32.mxu1 %vm1565_vm1, %v1564_v0 }
 0x16f   :  { %1366 = vmatprep.subr.mxu1 %v1564_v0 }
 0x22d   :  { %v247_v24 = vpop.f32.mrf.mxu1 }
 0x22e   :  { %v252_v25 = vsel %vm251_vm3, %v247_v24, -inf }
 0x22f   :  { %253 = vmax.xlane.f32.xlu0 %v252_v25  ;;  %v1360_v26 = vpop.f32.mrf.mxu1 }
 0x245   :  { %429 = vrot.lane.b32.xlu0 %v160_v20, %s1559_s22 }
 0x249   :  { %513 = vrot.lane.b32.xlu0 %v160_v20, %s1569_s2 }
 0x2b8   :  { %v254_v27 = vpop.xlane.xlu0 %253 }
 0x2b9   :  { %v255_v28 = vsub.f32 %v247_v24, %v254_v27 }
 0x2bb   :  { %v256_v29 = vmul.f32 1.442695, %v255_v28 }
 0x2bc   :  { %v430_v38 = vpop.permute.xlu0 %429 }
 0x2bd   :  { %1447 = vpow2.f32 %v256_v29 }
 0x2c0   :  { %v514_v53 = vpop.permute.xlu0 %513 }
 0x2ca   :  { %v1448_v30 = vpop.eup %1447 }
 0x2cb   :  { %v258_v31 = vsel %vm251_vm3, %v1448_v30, 0.0 }
 0x2cc   :  { %259 = vadd.xlane.f32.xlu1 %v258_v31 }
 0x2dd   :  { %340 = vrot.lane.b32.xlu1 %v170_v22, %s1570_s14 }
 0x2e1   :  { %62 = vrot.lane.b32.xlu1 %v60_v13, %s1567_s12 }
 0x355   :  { %v260_v33 = vpop.xlane.xlu1 %259 }
 0x356   :  { %1449 = vrcp.f32 %v260_v33 }
 0x359   :  { %v341_v34 = vpop.permute.xlu1 %340 }
 0x35d   :  { %v63_v35 = vpop.permute.xlu1 %62 }
 0x35e   :  { %1302 = vmatmul.mubr.msk.f32.gmra.mxu0 %vm88_vm0, %v63_v35 }
 0x35f   :  { %1388 = vmatprep.mubr.msk.f32.mxu0 %vm1565_vm1, %v1564_v0 }
 0x363   :  { %v1450_v36 = vpop.eup %1449 }
 0x364   :  { %v262_v37 = vmul.f32 %v1450_v36, %v1448_v30 }
 0x366   :  { %1364 = vmatmul.mubr.msk.f32.vlgmr.msra.gmra.mxu1 %vm251_vm3, %v262_v37 }
 0x367   :  { %1367 = vmatpush3.xpose.msk.msra.mxu1 %vm175_vm2, %v343_v32  ;;  %1368 = vmatprep.mubr.msk.f32.mxu1 %vm1565_vm1, %v1564_v0 }
 0x368   :  { %1371 = vmatprep.subr.mxu1 %v1564_v0 }
 0x36a   :  { %1369 = vmatmul.mubr.msk.f32.vlgmr.msra.gmra.mxu1 %vm175_vm2, %v341_v34 }
 0x36b   :  { %1372 = vmatpush3.msra.mxu1 %v430_v38  ;;  %1373 = vmatprep.mubr.msk.f32.mxu1 %vm1565_vm1, %v1564_v0 }
 0x36c   :  { %1376 = vmatprep.subr.mxu1 %v1564_v0 }
 0x41e   :  { %v165_v45 = vpop.f32.mrf.mxu0 }
 0x41f   :  { %v1662_v46 = vadd.f32 %v165_v45, %v1629_v18 }
 0x420   :  { %v1699_v3 = vpop.f32.mrf.mxu0 }
 0x421   :  { %v171_v52 = vmul.f32 0.28867513, %v1662_v46 }
 0x426   :  { %v335_v39 = vpop.f32.mrf.mxu1 }
 0x427   :  { %339 = vst.msk [vmem:[#allocation2] sm:$0xff] %vm175_vm2, %v335_v39 }
 0x428   :  { %v1365_v40 = vpop.f32.mrf.mxu1 }
 0x42a   :  { %v414_v41 = vpop.f32.mrf.mxu1 }
 0x42b   :  { %v418_v42 = vsel %vm251_vm3, %v414_v41, -inf }
 0x42c   :  { %419 = vmax.xlane.f32.xlu1 %v418_v42  ;;  %v1370_v43 = vpop.f32.mrf.mxu1 }
 0x43d   :  { %847 = vrot.lane.b32.xlu1 %v1662_v46, %s1568_s13 }
 0x4b5   :  { %v420_v47 = vpop.xlane.xlu1 %419 }
 0x4b6   :  { %v421_v48 = vsub.f32 %v414_v41, %v420_v47 }
 0x4b8   :  { %v422_v49 = vmul.f32 1.442695, %v421_v48 }
 0x4b9   :  { %v848_v57 = vpop.permute.xlu1 %847 }
 0x4ba   :  { %1451 = vpow2.f32 %v422_v49 }
 0x4c7   :  { %v1452_v50 = vpop.eup %1451 }
 0x4c8   :  { %v424_v51 = vsel %vm251_vm3, %v1452_v50, 0.0 }
 0x4c9   :  { %425 = vadd.xlane.f32.xlu0 %v424_v51 }
 0x4df   :  { %511 = vrot.lane.b32.xlu0 %v170_v22, %s1571_s15 }
 0x4e3   :  { %680 = vrot.lane.b32.xlu0 %v1662_v46, %s1567_s12 }
 0x4e7   :  { %845 = vrot.lane.b32.xlu0 %v171_v52, %s1570_s14 }
 0x4eb   :  { %1017 = vrot.lane.b32.xlu0 %v1662_v46, %s1569_s2 }
 0x4ef   :  { %1015 = vrot.lane.b32.xlu0 %v171_v52, %s1571_s15 }
 0x552   :  { %v426_v54 = vpop.xlane.xlu0 %425 }
 0x553   :  { %1453 = vrcp.f32 %v426_v54  ;;  %v1189_v54 = vld [vmem:[#allocation8 + $0x28] sm:$0xff] }
 0x556   :  { %v512_v55 = vpop.permute.xlu0 %511 }
 0x55a   :  { %v681_v56 = vpop.permute.xlu0 %680 }
 0x55b   :  { %1387 = vmatpush3.xpose.msk.msra.mxu0 %vm175_vm2, %v681_v56 }
 0x55c   :  { %1396 = vmatprep.subr.mxu0 %v1564_v0 }
 0x55e   :  { %1389 = vmatmul.mubr.msk.f32.vlgmr.msra.gmra.mxu0 %vm175_vm2, %v171_v52  ;;  %v846_v59 = vpop.permute.xlu0 %845  ;;  %v168_v52 = vadd.f32 %v1699_v3, %v1682_v62 }
 0x55f   :  { %1397 = vmatpush3.xpose.msk.msra.mxu0 %vm175_vm2, %v848_v57  ;;  %1398 = vmatprep.mubr.msk.f32.mxu0 %vm1565_vm1, %v1564_v0  ;;  %v1187_v57 = vld [vmem:[#allocation8 + $0x18] sm:$0xff] }
 0x560   :  { %v1454_v60 = vpop.eup %1453  ;;  %1406 = vmatprep.subr.mxu0 %v1564_v0 }
 0x561   :  { %v428_v61 = vmul.f32 %v1454_v60, %v1452_v50  ;;  %v1185_v60 = vld [vmem:[#allocation8 + $0x8] sm:$0xff] }
 0x562   :  { %v1018_v63 = vpop.permute.xlu0 %1017  ;;  %1399 = vmatmul.mubr.msk.f32.vlgmr.msra.gmra.mxu0 %vm175_vm2, %v846_v59 }
 0x563   :  { %1374 = vmatmul.mubr.msk.f32.vlgmr.msra.gmra.mxu1 %vm251_vm3, %v428_v61  ;;  %1407 = vmatpush3.xpose.msk.msra.mxu0 %vm175_vm2, %v1018_v63  ;;  %v1184_v61 = vld [vmem:[#allocation8] sm:$0xff] }
 0x564   :  { %1377 = vmatpush3.xpose.msk.msra.mxu1 %vm175_vm2, %v514_v53  ;;  %1378 = vmatprep.mubr.msk.f32.mxu1 %vm1565_vm1, %v1564_v0 }
 0x565   :  { %1381 = vmatprep.subr.mxu1 %v1564_v0  ;;  %1408 = vmatprep.mubr.msk.f32.mxu0 %vm1565_vm1, %v1564_v0 }
 0x566   :  { %v1016_v2 = vpop.permute.xlu0 %1015  ;;  %1416 = vmatprep.subr.mxu0 %v1189_v54 }
 0x567   :  { %1379 = vmatmul.mubr.msk.f32.vlgmr.msra.gmra.mxu1 %vm175_vm2, %v512_v55  ;;  %1409 = vmatmul.mubr.msk.f32.vlgmr.msra.gmra.mxu0 %vm175_vm2, %v1016_v2  ;;  %v1188_v55 = vld [vmem:[#allocation8 + $0x20] sm:$0xff] }
 0x568   :  { %1382 = vmatpush3.msra.mxu1 %v162_v1  ;;  %1383 = vmatprep.mubr.msk.f32.mxu1 %vm1565_vm1, %v1564_v0 }
 0x569   :  { %1391 = vmatprep.subr.mxu1 %v1564_v0  ;;  %1417 = vmatpush3.msra.mxu0 %v1189_v54 }
 0x56a   :  { %1418 = vmatprep.subr.mxu0 %v1188_v55 }
 0x56b   :  { %1419 = vmatpush3.msra.mxu0 %v1188_v55 }
 0x56c   :  { %1420 = vmatprep.subr.mxu0 %v1187_v57 }
 0x56d   :  { %1421 = vmatpush3.msra.mxu0 %v1187_v57 }
 0x56e   :  { %1422 = vmatprep.subr.mxu0 %v1186_v58 }
 0x56f   :  { %1423 = vmatpush3.msra.mxu0 %v1186_v58 }
 0x570   :  { %1424 = vmatprep.subr.mxu0 %v1185_v60 }
 0x571   :  { %1425 = vmatpush3.msra.mxu0 %v1185_v60 }
 0x572   :  { %1426 = vmatprep.subr.mxu0 %v1184_v61 }
 0x573   :  { %1427 = vmatpush3.msra.mxu0 %v1184_v61 }
 0x61e   :  { %v753_v4 = vpop.f32.mrf.mxu0 }
 0x61f   :  { %v757_v5 = vsel %vm251_vm3, %v753_v4, -inf }
 0x620   :  { %758 = vmax.xlane.f32.xlu1 %v757_v5  ;;  %v1390_v6 = vpop.f32.mrf.mxu0 }
 0x622   :  { %v919_v7 = vpop.f32.mrf.mxu0 }
 0x623   :  { %v501_v8 = vpop.f32.mrf.mxu1  ;;  %v923_v16 = vsel %vm251_vm3, %v919_v7, -inf }
 0x624   :  { %v1400_v9 = vpop.f32.mrf.mxu0 }
 0x625   :  { %v1375_v10 = vpop.f32.mrf.mxu1  ;;  %v1321_v9 = vld [vmem:[%s1748_s4] ss:$0 sm:$0xff] }
 0x627   :  { %v585_v11 = vpop.f32.mrf.mxu1  ;;  %v1089_v12 = vpop.f32.mrf.mxu0 }
 0x628   :  { %v589_v13 = vsel %vm251_vm3, %v585_v11, -inf  ;;  %v1093_v17 = vsel %vm251_vm3, %v1089_v12, -inf }
 0x629   :  { %v1410_v14 = vpop.f32.mrf.mxu0  ;;  %590 = vmax.xlane.f32.xlu0 %v589_v13  ;;  %v1380_v15 = vpop.f32.mrf.mxu1 }
 0x62d   :  { %924 = vmax.xlane.f32.xlu0 %v923_v16 }
 0x631   :  { %1094 = vmax.xlane.f32.xlu0 %v1093_v17 }
 0x6a9   :  { %v759_v18 = vpop.xlane.xlu1 %758 }
 0x6aa   :  { %v760_v19 = vsub.f32 %v753_v4, %v759_v18 }
 0x6ac   :  { %v761_v20 = vmul.f32 1.442695, %v760_v19 }
 0x6ae   :  { %1455 = vpow2.f32 %v761_v20 }
 0x6b2   :  { %v591_v21 = vpop.xlane.xlu0 %590 }
 0x6b3   :  { %v592_v22 = vsub.f32 %v585_v11, %v591_v21 }
 0x6b5   :  { %v593_v25 = vmul.f32 1.442695, %v592_v22 }
 0x6b6   :  { %v925_v23 = vpop.xlane.xlu0 %924 }
 0x6b7   :  { %v926_v24 = vsub.f32 %v919_v7, %v925_v23 }
 0x6b9   :  { %v927_v26 = vmul.f32 1.442695, %v926_v24 }
 0x6ba   :  { %v1095_v27 = vpop.xlane.xlu0 %1094 }
 0x6bb   :  { %v1456_v28 = vpop.eup %1455  ;;  %1457 = vpow2.f32 %v927_v26  ;;  %v1096_v29 = vsub.f32 %v1089_v12, %v1095_v27 }
 0x6bc   :  { %v763_v30 = vsel %vm251_vm3, %v1456_v28, 0.0  ;;  %1459 = vpow2.f32 %v593_v25 }
 0x6bd   :  { %v1097_v31 = vmul.f32 1.442695, %v1096_v29  ;;  %764 = vadd.xlane.f32.xlu0 %v763_v30 }
 0x6bf   :  { %1461 = vpow2.f32 %v1097_v31 }
 0x6c8   :  { %v1458_v32 = vpop.eup %1457 }
 0x6c9   :  { %v929_v33 = vsel %vm251_vm3, %v1458_v32, 0.0  ;;  %v1460_v34 = vpop.eup %1459 }
 0x6ca   :  { %930 = vadd.xlane.f32.xlu1 %v929_v33  ;;  %v595_v36 = vsel %vm251_vm3, %v1460_v34, 0.0 }
 0x6cc   :  { %v1462_v35 = vpop.eup %1461 }
 0x6cd   :  { %v1099_v37 = vsel %vm251_vm3, %v1462_v35, 0.0 }
 0x6ce   :  { %596 = vadd.xlane.f32.xlu1 %v595_v36  ;;  %1100 = vadd.xlane.f32.xlu0 %v1099_v37 }
 0x6df   :  { %768 = vrot.lane.b32.xlu1 %v1662_v46, %s1566_s11 }
 0x6e3   :  { %506 = vrot.lane.b32.xlu1 %v501_v8, %s1559_s22 }
 0x6e4   :  { %934 = vrot.lane.b32.xlu0 %v1662_v46, %s1559_s22 }
 0x746   :  { %v765_v39 = vpop.xlane.xlu0 %764 }
 0x753   :  { %v931_v38 = vpop.xlane.xlu1 %930 }
 0x757   :  { %v597_v40 = vpop.xlane.xlu1 %596  ;;  %v1101_v42 = vpop.xlane.xlu0 %1100 }
 0x758   :  { %1463 = vrcp.f32 %v597_v40 }
 0x759   :  { %1465 = vrcp.f32 %v765_v39 }
 0x75a   :  { %1467 = vrcp.f32 %v931_v38 }
 0x75b   :  { %v769_v41 = vpop.permute.xlu1 %768  ;;  %1469 = vrcp.f32 %v1101_v42  ;;  %v935_v49 = vpop.permute.xlu0 %934 }
 0x75f   :  { %v507_v43 = vpop.permute.xlu1 %506 }
 0x760   :  { %510 = vst.msk [vmem:[#allocation2] sm:$0xff] %vm509_vm4, %v507_v43 }
 0x765   :  { %v1464_v44 = vpop.eup %1463 }
 0x766   :  { %v599_v45 = vmul.f32 %v1464_v44, %v1460_v34  ;;  %v1466_v47 = vpop.eup %1465 }
 0x767   :  { %v767_v46 = vmul.f32 %v1466_v47, %v1456_v28  ;;  %v1468_v48 = vpop.eup %1467 }
 0x768   :  { %1384 = vmatmul.mubr.msk.f32.vlgmr.msra.gmra.mxu1 %vm251_vm3, %v599_v45  ;;  %v933_v50 = vmul.f32 %v1468_v48, %v1458_v32  ;;  %v1470_v51 = vpop.eup %1469 }
 0x769   :  { %1392 = vmatpush3.msra.mxu1 %v769_v41  ;;  %1393 = vmatprep.mubr.msk.f32.mxu1 %vm1565_vm1, %v1564_v0  ;;  %v1103_v53 = vmul.f32 %v1470_v51, %v1462_v35 }
 0x76a   :  { %1401 = vmatprep.subr.mxu1 %v1564_v0 }
 0x76c   :  { %1394 = vmatmul.mubr.msk.f32.vlgmr.msra.gmra.mxu1 %vm251_vm3, %v767_v46 }
 0x76d   :  { %1402 = vmatpush3.msra.mxu1 %v935_v49  ;;  %1403 = vmatprep.mubr.msk.f32.mxu1 %vm1565_vm1, %v1564_v0 }
 0x76e   :  { %1411 = vmatprep.subr.mxu1 %v1564_v0 }
 0x770   :  { %1404 = vmatmul.mubr.msk.f32.vlgmr.msra.gmra.mxu1 %vm251_vm3, %v933_v50 }
 0x771   :  { %1412 = vmatpush3.msra.mxu1 %v168_v52  ;;  %1413 = vmatprep.mubr.msk.f32.mxu1 %vm1565_vm1, %v1564_v0 }
 0x774   :  { %1414 = vmatmul.mubr.msk.f32.vlgmr.msra.gmra.mxu1 %vm251_vm3, %v1103_v53 }
 0x828   :  { %v669_v56 = vpop.f32.mrf.mxu1 }
 0x829   :  { %674 = vrot.lane.b32.xlu1 %v669_v56, %s1566_s11 }
 0x82a   :  { %v1385_v59 = vpop.f32.mrf.mxu1 }
 0x82c   :  { %v840_v0 = vpop.f32.mrf.mxu1 }
 0x82d   :  { %844 = vst.msk [vmem:[#allocation2 + $0x8] sm:$0xff] %vm175_vm2, %v840_v0 }
 0x82e   :  { %v1395_v62 = vpop.f32.mrf.mxu1 }
 0x830   :  { %v1006_v63 = vpop.f32.mrf.mxu1 }
 0x831   :  { %1011 = vrot.lane.b32.xlu0 %v1006_v63, %s1559_s22 }
 0x832   :  { %v1405_v1 = vpop.f32.mrf.mxu1 }
 0x834   :  { %v1173_v2 = vpop.f32.mrf.mxu1 }
 0x835   :  { %1178 = vrot.lane.b32.xlu1 %v1173_v2, %s1566_s11 }
 0x836   :  { %v1415_v3 = vpop.f32.mrf.mxu1 }
 0x89b   :  { %v675_v4 = vpop.permute.xlu1 %674 }
 0x89c   :  { %678 = vst.msk [vmem:[#allocation2] sm:$0xff] %vm677_vm5, %v675_v4 }
 0x8a3   :  { %v1012_v5 = vpop.permute.xlu0 %1011  ;;  %v1182_v6 = vld [vmem:[#allocation2] sm:$0xff] }
 0x8a4   :  { %1014 = vst.msk [vmem:[#allocation2 + $0x8] sm:$0xff] %vm509_vm4, %v1012_v5  ;;  %1428 = vmatprep.mubr.msk.f32.mxu0 %vm88_vm0, %v1182_v6 }
 0x8a7   :  { %v1179_v7 = vpop.permute.xlu1 %1178 }
 0x8a8   :  { %1181 = vst.msk [vmem:[#allocation2 + $0x8] sm:$0xff] %vm677_vm5, %v1179_v7 }
 0x8af   :  { %v1183_v8 = vld [vmem:[#allocation2 + $0x8] sm:$0xff] }
 0x8b0   :  { %1429 = vmatmul.mubr.msk.f32.vlgmr.msra.gmra.mxu0 %vm88_vm0, %v1183_v8 }
 0x970   :  { %v1430_v10 = vpop.f32.mrf.mxu0 }
 0x971   :  { %v1275_v11 = vadd.f32 %v1430_v10, %v1321_v9 }
 0x972   :  { %v1269_v12 = vpop.f32.mrf.mxu0 }
 0x973   :  { %v1270_v13 = vadd.f32 %v1321_v9, %v1269_v12  ;;  %1280 = vrot.lane.b32.xlu0 %v1275_v11, %s1569_s2 }
 0x975   :  { %1278 = vst.msk [vmem:[#allocation9] sm:$0xff] %vm88_vm0, %v1270_v13 }
 0x9e5   :  { %v1281_v14 = vpop.permute.xlu0 %1280 }
 0x9e6   :  { %1284 = vst.msk [vmem:[#allocation9] sm:$0xff] %vm1283_vm6, %v1281_v14 }
 0x9e7   :  { %1542 = shalt.err (!%p1539_p5)
}
 0x9e8   :  { %1294 = dma.vmem_to_hbm [thread:$0]  %s1292_s19, 128, %s1749_s5, [#allocation5]  }
 0x9e9   :  { %1555 = dma.done.wait [#allocation5], 128  }
 0x9ea   :  { %1556 = vsyncadd [#allocation5], 4294967168 }
 0x9eb   :  { %1298 = vsyncpa [#allocation4], 1 }
 0x9ec   :  { %1299 = vsyncpa [#allocation7], 1 }
 0x9ed   :  { %1300 = vsyncpa [#allocation5], 1 }

</bundles_post_ra>
